<compile_context>
chip_gen: v7x
topology: tpu7x:2x2x1
jax: 0.10.0
libtpu: 0.0.40
codegen_flags: <defaults>
</compile_context>

<pallas_src>
import functools

import jax
import jax.numpy as jnp
from jax.experimental import pallas as pl
from jax.experimental.pallas import tpu as pltpu


def _classifier_kernel(num_rnn_layers, seq_len, *refs):
    # refs layout:
    #   x_ref (L, bb, D),
    #   layer 0:   wih_t (D,H),  whh_t (H,H),  b (1,H)
    #   layer l>0: wih_t (H,H),  whh_t (H,H),  b (1,H)
    #   w_eff_t (H, C)  [already scaled by 1/L],  b_eff (1, C),
    #   out_ref (bb, C)
    x_ref = refs[0]
    out_ref = refs[-1]
    params = refs[1:-1]

    L = seq_len
    x = x_ref[...].astype(jnp.float32)           # (L, bb, D)
    bb = x.shape[1]
    D = x.shape[2]

    # Unpack parameters; hoist bias broadcasts out of the unrolled loops.
    wih, whh, bias = [], [], []
    idx = 0
    for _ in range(num_rnn_layers):
        wih.append(params[idx][...])             # (Din, H)
        whh.append(params[idx + 1][...])         # (H, H)
        b = params[idx + 2][...]                 # (1, H) == b_ih + b_hh
        bias.append(jnp.broadcast_to(b, (bb, b.shape[1])))
        idx += 3
    w_eff_t = params[idx][...]                   # (H, C)  folded FC + out, /L
    b_eff = params[idx + 1][...]                 # (1, C)

    H = whh[0].shape[0]

    # Hoist layer-0's input projection out of the recurrence: one batched
    # (L*bb, D) x (D, H) matmul instead of L tiny ones on the serial chain.
    # Layer-0's bias is folded in here too (one broadcast add, off-chain).
    x_proj = (
        jnp.dot(x.reshape(L * bb, D), wih[0], preferred_element_type=jnp.float32)
        + jnp.broadcast_to(params[2][...], (L * bb, H))
    ).reshape(L, bb, H)

    # Wavefront over (layer, time): at step s, layer l handles time t = s - l.
    # All active layer updates within one step are mutually independent.
    h = [jnp.zeros((bb, H), jnp.float32) for _ in range(num_rnn_layers)]
    acc = jnp.zeros((bb, H), jnp.float32)        # running sum for mean(dim=1)
    for s in range(L + num_rnn_layers - 1):
        # Descend layers so h[l-1] still holds the PREVIOUS step's value
        # (i.e. layer l-1's output at time t), as the wavefront requires.
        for l in range(num_rnn_layers - 1, -1, -1):
            t = s - l
            if 0 <= t < L:
                if l == 0:
                    pre = x_proj[t]              # pre-projected input + bias
                else:
                    pre = jnp.dot(h[l - 1], wih[l],
                                  preferred_element_type=jnp.float32) + bias[l]
                h_new = jnp.tanh(
                    pre + jnp.dot(h[l], whh[l],
                                  preferred_element_type=jnp.float32)
                )
                h[l] = h_new
                if l == num_rnn_layers - 1:
                    acc = acc + h_new

    # dropout: identity at inference (nn.Dropout eval mode).
    # mean(dim=1)'s 1/L scale and the FC stack + output layer were folded
    # host-side into (w_eff_t, b_eff); the epilogue is a single affine map.
    logits = jnp.dot(acc, w_eff_t, preferred_element_type=jnp.float32) + b_eff
    out_ref[...] = logits.astype(out_ref.dtype)


def simple_rnn_classifier(x, rnn_params, fc_params, out_params):
    """Runs the whole forward pass inside one Pallas kernel.

    rnn_params: list of (w_ih (H,Din), w_hh (H,H), b_ih (H,), b_hh (H,))
    fc_params:  list of (w (Dout,Din), b (Dout,))
    out_params: (w (C,Dfc), b (C,))
    """
    B, L, D = x.shape
    H = rnn_params[0][1].shape[0]

    # (B, L, D) -> (L, B, D): per-timestep data becomes a leading-axis slice
    # and the hoisted input projection is a single contiguous matmul.
    x_lbd = jnp.transpose(x, (1, 0, 2))

    flat_inputs = [x_lbd]
    for (w_ih, w_hh, b_ih, b_hh) in rnn_params:
        flat_inputs += [w_ih.T, w_hh.T, (b_ih + b_hh)[None, :]]

    # Fold the activation-free FC chain and the output layer into a single
    # affine map on the host: logits = feat @ W_eff^T + b_eff.  Also fold the
    # 1/L mean scale into W_eff so the kernel epilogue is exactly one dot.
    w_eff = jnp.eye(H, dtype=jnp.float32)
    b_eff = jnp.zeros((H,), jnp.float32)
    for (w, b) in fc_params:
        b_eff = w @ b_eff + b
        w_eff = w @ w_eff
    w_out, b_out = out_params
    b_eff = w_out @ b_eff + b_out
    w_eff = w_out @ w_eff
    num_classes = w_out.shape[0]
    flat_inputs += [w_eff.T * (1.0 / L), b_eff[None, :]]

    # Batch grid axis (parallel -> shards across TensorCores on v7x when B is
    # tiled). At these toy shapes the full batch fits one program (grid = 1).
    bb = B
    grid = (pl.cdiv(B, bb),)

    in_specs = [pl.BlockSpec((L, bb, D), lambda i: (0, i, 0))]
    # All remaining inputs are small 2-D weights/biases: full-array blocks.
    in_specs += [pl.BlockSpec(a.shape, lambda i: (0, 0)) for a in flat_inputs[1:]]
    out_spec = pl.BlockSpec((bb, num_classes), lambda i: (i, 0))

    kernel = functools.partial(_classifier_kernel, len(rnn_params), L)
    return pl.pallas_call(
        kernel,
        out_shape=jax.ShapeDtypeStruct((B, num_classes), jnp.float32),
        grid=grid,
        in_specs=in_specs,
        out_specs=out_spec,
        compiler_params=pltpu.CompilerParams(
            dimension_semantics=("parallel",)),
    )(*flat_inputs)


def reference(x, rnn_params, fc_params, out_params):
    """Pure-JAX reference for correctness checking."""
    B, L, _ = x.shape
    layer_in = x
    for (w_ih, w_hh, b_ih, b_hh) in rnn_params:
        H = w_hh.shape[0]
        h = jnp.zeros((B, H), jnp.float32)
        outs = []
        for t in range(L):
            h = jnp.tanh(layer_in[:, t, :] @ w_ih.T + b_ih + h @ w_hh.T + b_hh)
            outs.append(h)
        layer_in = jnp.stack(outs, axis=1)
    feat = jnp.mean(layer_in, axis=1)
    for (w, b) in fc_params:
        feat = feat @ w.T + b
    w_out, b_out = out_params
    return feat @ w_out.T + b_out


if __name__ == "__main__":
    # Small, module-consistent shapes.
    B, L = 2, 8
    input_dim = 12              # e.g. 4 markers * 3 coords
    rnn_hidden_dim, num_rnn_layers = 32, 2
    fc_hidden_dim, num_fc_layers = 32, 2   # fc_hidden == rnn_hidden so the
                                           # PyTorch fc stack is shape-valid
    num_classes = 5

    key = jax.random.PRNGKey(0)
    keys = iter(jax.random.split(key, 64))

    def uni(shape, bound):
        return jax.random.uniform(next(keys), shape, jnp.float32, -bound, bound)

    # Deterministic init mirroring PyTorch's U(-1/sqrt(fan), 1/sqrt(fan)).
    rnn_params = []
    for layer in range(num_rnn_layers):
        d_in = input_dim if layer == 0 else rnn_hidden_dim
        k = 1.0 / (rnn_hidden_dim ** 0.5)
        rnn_params.append(
            (
                uni((rnn_hidden_dim, d_in), k),
                uni((rnn_hidden_dim, rnn_hidden_dim), k),
                uni((rnn_hidden_dim,), k),
                uni((rnn_hidden_dim,), k),
            )
        )

    fc_params = []
    for _ in range(num_fc_layers):
        k = 1.0 / (rnn_hidden_dim ** 0.5)
        fc_params.append((uni((fc_hidden_dim, rnn_hidden_dim), k),
                          uni((fc_hidden_dim,), k)))

    k = 1.0 / (fc_hidden_dim ** 0.5)
    out_params = (uni((num_classes, fc_hidden_dim), k), uni((num_classes,), k))

    x = jax.random.normal(next(keys), (B, L, input_dim), jnp.float32)

    y = simple_rnn_classifier(x, rnn_params, fc_params, out_params)
    y = jax.block_until_ready(y)

    y_ref = reference(x, rnn_params, fc_params, out_params)
    assert y.shape == (B, num_classes)
    assert jnp.allclose(y, y_ref, atol=1e-4, rtol=1e-4), (y, y_ref)
    print("KERNEL_OK")
</pallas_src>

<mosaic_0001>
module attributes {stable_mosaic.version = 11 : i64} {
  func.func @_classifier_kernel(%arg0: i32, %arg1: memref<8x2x12xf32, #tpu.memory_space<vmem>>, %arg2: memref<12x32xf32, #tpu.memory_space<vmem>>, %arg3: memref<32x32xf32, #tpu.memory_space<vmem>>, %arg4: memref<1x32xf32, #tpu.memory_space<vmem>>, %arg5: memref<32x32xf32, #tpu.memory_space<vmem>>, %arg6: memref<32x32xf32, #tpu.memory_space<vmem>>, %arg7: memref<1x32xf32, #tpu.memory_space<vmem>>, %arg8: memref<32x5xf32, #tpu.memory_space<vmem>>, %arg9: memref<1x5xf32, #tpu.memory_space<vmem>>, %arg10: memref<2x5xf32, #tpu.memory_space<vmem>>) attributes {dimension_semantics = [#tpu.dimension_semantics<parallel>], iteration_bounds = array<i64: 1>, scalar_prefetch = 0 : i64, scratch_operands = 0 : i64, tpu.core_type = #tpu.core_type<tc>, window_params = [{transform_indices = @transform_0, window_bounds = array<i64: 8, 2, 12>}, {pipeline_mode = #tpu.pipeline_mode<synchronous>, transform_indices = @transform_1, window_bounds = array<i64: 12, 32>}, {pipeline_mode = #tpu.pipeline_mode<synchronous>, transform_indices = @transform_2, window_bounds = array<i64: 32, 32>}, {pipeline_mode = #tpu.pipeline_mode<synchronous>, transform_indices = @transform_3, window_bounds = array<i64: 1, 32>}, {pipeline_mode = #tpu.pipeline_mode<synchronous>, transform_indices = @transform_4, window_bounds = array<i64: 32, 32>}, {pipeline_mode = #tpu.pipeline_mode<synchronous>, transform_indices = @transform_5, window_bounds = array<i64: 32, 32>}, {pipeline_mode = #tpu.pipeline_mode<synchronous>, transform_indices = @transform_6, window_bounds = array<i64: 1, 32>}, {pipeline_mode = #tpu.pipeline_mode<synchronous>, transform_indices = @transform_7, window_bounds = array<i64: 32, 5>}, {pipeline_mode = #tpu.pipeline_mode<synchronous>, transform_indices = @transform_8, window_bounds = array<i64: 1, 5>}, {transform_indices = @transform_9, window_bounds = array<i64: 2, 5>}]} {
    %c0 = arith.constant 0 : index
    %c0_0 = arith.constant 0 : index
    %c0_1 = arith.constant 0 : index
    %0 = vector.load %arg1[%c0, %c0_0, %c0_1] : memref<8x2x12xf32, #tpu.memory_space<vmem>>, vector<8x2x12xf32>
    %c0_2 = arith.constant 0 : index
    %c0_3 = arith.constant 0 : index
    %1 = vector.load %arg2[%c0_2, %c0_3] : memref<12x32xf32, #tpu.memory_space<vmem>>, vector<12x32xf32>
    %c0_4 = arith.constant 0 : index
    %c0_5 = arith.constant 0 : index
    %2 = vector.load %arg3[%c0_4, %c0_5] : memref<32x32xf32, #tpu.memory_space<vmem>>, vector<32x32xf32>
    %c0_6 = arith.constant 0 : index
    %c0_7 = arith.constant 0 : index
    %3 = vector.load %arg5[%c0_6, %c0_7] : memref<32x32xf32, #tpu.memory_space<vmem>>, vector<32x32xf32>
    %c0_8 = arith.constant 0 : index
    %c0_9 = arith.constant 0 : index
    %4 = vector.load %arg6[%c0_8, %c0_9] : memref<32x32xf32, #tpu.memory_space<vmem>>, vector<32x32xf32>
    %c0_10 = arith.constant 0 : index
    %c0_11 = arith.constant 0 : index
    %5 = vector.load %arg7[%c0_10, %c0_11] : memref<1x32xf32, #tpu.memory_space<vmem>>, vector<1x32xf32>
    %6 = vector.shape_cast %5 : vector<1x32xf32> to vector<1x32xf32>
    %7 = vector.broadcast %6 : vector<1x32xf32> to vector<2x32xf32>
    %c0_12 = arith.constant 0 : index
    %c0_13 = arith.constant 0 : index
    %8 = vector.load %arg8[%c0_12, %c0_13] : memref<32x5xf32, #tpu.memory_space<vmem>>, vector<32x5xf32>
    %c0_14 = arith.constant 0 : index
    %c0_15 = arith.constant 0 : index
    %9 = vector.load %arg9[%c0_14, %c0_15] : memref<1x5xf32, #tpu.memory_space<vmem>>, vector<1x5xf32>
    %10 = vector.shape_cast %0 : vector<8x2x12xf32> to vector<16x12xf32>
    %cst = arith.constant dense<0.000000e+00> : vector<16x32xf32>
    %11 = tpu.matmul %10, %1, %cst {dimension_numbers = #tpu.dot_dimension_numbers<[1], [0], [0], [1], [0, 0, 1, 1], [], []>} : vector<16x12xf32>, vector<12x32xf32>, vector<16x32xf32> -> vector<16x32xf32>
    %c0_16 = arith.constant 0 : index
    %c0_17 = arith.constant 0 : index
    %12 = vector.load %arg4[%c0_16, %c0_17] : memref<1x32xf32, #tpu.memory_space<vmem>>, vector<1x32xf32>
    %13 = vector.shape_cast %12 : vector<1x32xf32> to vector<1x32xf32>
    %14 = vector.broadcast %13 : vector<1x32xf32> to vector<16x32xf32>
    %15 = arith.addf %11, %14 : vector<16x32xf32>
    %16 = vector.shape_cast %15 : vector<16x32xf32> to vector<8x2x32xf32>
    %cst_18 = arith.constant 0.000000e+00 : f32
    %17 = vector.broadcast %cst_18 : f32 to vector<2x32xf32>
    %cst_19 = arith.constant 0.000000e+00 : f32
    %18 = vector.broadcast %cst_19 : f32 to vector<2x32xf32>
    %cst_20 = arith.constant 0.000000e+00 : f32
    %19 = vector.broadcast %cst_20 : f32 to vector<2x32xf32>
    %20 = vector.extract_strided_slice %16 {offsets = [0, 0, 0], sizes = [1, 2, 32], strides = [1, 1, 1]} : vector<8x2x32xf32> to vector<1x2x32xf32>
    %21 = vector.shape_cast %20 : vector<1x2x32xf32> to vector<2x32xf32>
    %cst_21 = arith.constant dense<0.000000e+00> : vector<2x32xf32>
    %22 = tpu.matmul %17, %2, %cst_21 {dimension_numbers = #tpu.dot_dimension_numbers<[1], [0], [0], [1], [0, 0, 1, 1], [], []>} : vector<2x32xf32>, vector<32x32xf32>, vector<2x32xf32> -> vector<2x32xf32>
    %23 = arith.addf %21, %22 : vector<2x32xf32>
    %24 = math.tanh %23 : vector<2x32xf32>
    %cst_22 = arith.constant dense<0.000000e+00> : vector<2x32xf32>
    %25 = tpu.matmul %24, %3, %cst_22 {dimension_numbers = #tpu.dot_dimension_numbers<[1], [0], [0], [1], [0, 0, 1, 1], [], []>} : vector<2x32xf32>, vector<32x32xf32>, vector<2x32xf32> -> vector<2x32xf32>
    %26 = arith.addf %25, %7 : vector<2x32xf32>
    %cst_23 = arith.constant dense<0.000000e+00> : vector<2x32xf32>
    %27 = tpu.matmul %18, %4, %cst_23 {dimension_numbers = #tpu.dot_dimension_numbers<[1], [0], [0], [1], [0, 0, 1, 1], [], []>} : vector<2x32xf32>, vector<32x32xf32>, vector<2x32xf32> -> vector<2x32xf32>
    %28 = arith.addf %26, %27 : vector<2x32xf32>
    %29 = math.tanh %28 : vector<2x32xf32>
    %30 = arith.addf %19, %29 : vector<2x32xf32>
    %31 = vector.extract_strided_slice %16 {offsets = [1, 0, 0], sizes = [1, 2, 32], strides = [1, 1, 1]} : vector<8x2x32xf32> to vector<1x2x32xf32>
    %32 = vector.shape_cast %31 : vector<1x2x32xf32> to vector<2x32xf32>
    %cst_24 = arith.constant dense<0.000000e+00> : vector<2x32xf32>
    %33 = tpu.matmul %24, %2, %cst_24 {dimension_numbers = #tpu.dot_dimension_numbers<[1], [0], [0], [1], [0, 0, 1, 1], [], []>} : vector<2x32xf32>, vector<32x32xf32>, vector<2x32xf32> -> vector<2x32xf32>
    %34 = arith.addf %32, %33 : vector<2x32xf32>
    %35 = math.tanh %34 : vector<2x32xf32>
    %cst_25 = arith.constant dense<0.000000e+00> : vector<2x32xf32>
    %36 = tpu.matmul %35, %3, %cst_25 {dimension_numbers = #tpu.dot_dimension_numbers<[1], [0], [0], [1], [0, 0, 1, 1], [], []>} : vector<2x32xf32>, vector<32x32xf32>, vector<2x32xf32> -> vector<2x32xf32>
    %37 = arith.addf %36, %7 : vector<2x32xf32>
    %cst_26 = arith.constant dense<0.000000e+00> : vector<2x32xf32>
    %38 = tpu.matmul %29, %4, %cst_26 {dimension_numbers = #tpu.dot_dimension_numbers<[1], [0], [0], [1], [0, 0, 1, 1], [], []>} : vector<2x32xf32>, vector<32x32xf32>, vector<2x32xf32> -> vector<2x32xf32>
    %39 = arith.addf %37, %38 : vector<2x32xf32>
    %40 = math.tanh %39 : vector<2x32xf32>
    %41 = arith.addf %30, %40 : vector<2x32xf32>
    %42 = vector.extract_strided_slice %16 {offsets = [2, 0, 0], sizes = [1, 2, 32], strides = [1, 1, 1]} : vector<8x2x32xf32> to vector<1x2x32xf32>
    %43 = vector.shape_cast %42 : vector<1x2x32xf32> to vector<2x32xf32>
    %cst_27 = arith.constant dense<0.000000e+00> : vector<2x32xf32>
    %44 = tpu.matmul %35, %2, %cst_27 {dimension_numbers = #tpu.dot_dimension_numbers<[1], [0], [0], [1], [0, 0, 1, 1], [], []>} : vector<2x32xf32>, vector<32x32xf32>, vector<2x32xf32> -> vector<2x32xf32>
    %45 = arith.addf %43, %44 : vector<2x32xf32>
    %46 = math.tanh %45 : vector<2x32xf32>
    %cst_28 = arith.constant dense<0.000000e+00> : vector<2x32xf32>
    %47 = tpu.matmul %46, %3, %cst_28 {dimension_numbers = #tpu.dot_dimension_numbers<[1], [0], [0], [1], [0, 0, 1, 1], [], []>} : vector<2x32xf32>, vector<32x32xf32>, vector<2x32xf32> -> vector<2x32xf32>
    %48 = arith.addf %47, %7 : vector<2x32xf32>
    %cst_29 = arith.constant dense<0.000000e+00> : vector<2x32xf32>
    %49 = tpu.matmul %40, %4, %cst_29 {dimension_numbers = #tpu.dot_dimension_numbers<[1], [0], [0], [1], [0, 0, 1, 1], [], []>} : vector<2x32xf32>, vector<32x32xf32>, vector<2x32xf32> -> vector<2x32xf32>
    %50 = arith.addf %48, %49 : vector<2x32xf32>
    %51 = math.tanh %50 : vector<2x32xf32>
    %52 = arith.addf %41, %51 : vector<2x32xf32>
    %53 = vector.extract_strided_slice %16 {offsets = [3, 0, 0], sizes = [1, 2, 32], strides = [1, 1, 1]} : vector<8x2x32xf32> to vector<1x2x32xf32>
    %54 = vector.shape_cast %53 : vector<1x2x32xf32> to vector<2x32xf32>
    %cst_30 = arith.constant dense<0.000000e+00> : vector<2x32xf32>
    %55 = tpu.matmul %46, %2, %cst_30 {dimension_numbers = #tpu.dot_dimension_numbers<[1], [0], [0], [1], [0, 0, 1, 1], [], []>} : vector<2x32xf32>, vector<32x32xf32>, vector<2x32xf32> -> vector<2x32xf32>
    %56 = arith.addf %54, %55 : vector<2x32xf32>
    %57 = math.tanh %56 : vector<2x32xf32>
    %cst_31 = arith.constant dense<0.000000e+00> : vector<2x32xf32>
    %58 = tpu.matmul %57, %3, %cst_31 {dimension_numbers = #tpu.dot_dimension_numbers<[1], [0], [0], [1], [0, 0, 1, 1], [], []>} : vector<2x32xf32>, vector<32x32xf32>, vector<2x32xf32> -> vector<2x32xf32>
    %59 = arith.addf %58, %7 : vector<2x32xf32>
    %cst_32 = arith.constant dense<0.000000e+00> : vector<2x32xf32>
    %60 = tpu.matmul %51, %4, %cst_32 {dimension_numbers = #tpu.dot_dimension_numbers<[1], [0], [0], [1], [0, 0, 1, 1], [], []>} : vector<2x32xf32>, vector<32x32xf32>, vector<2x32xf32> -> vector<2x32xf32>
    %61 = arith.addf %59, %60 : vector<2x32xf32>
    %62 = math.tanh %61 : vector<2x32xf32>
    %63 = arith.addf %52, %62 : vector<2x32xf32>
    %64 = vector.extract_strided_slice %16 {offsets = [4, 0, 0], sizes = [1, 2, 32], strides = [1, 1, 1]} : vector<8x2x32xf32> to vector<1x2x32xf32>
    %65 = vector.shape_cast %64 : vector<1x2x32xf32> to vector<2x32xf32>
    %cst_33 = arith.constant dense<0.000000e+00> : vector<2x32xf32>
    %66 = tpu.matmul %57, %2, %cst_33 {dimension_numbers = #tpu.dot_dimension_numbers<[1], [0], [0], [1], [0, 0, 1, 1], [], []>} : vector<2x32xf32>, vector<32x32xf32>, vector<2x32xf32> -> vector<2x32xf32>
    %67 = arith.addf %65, %66 : vector<2x32xf32>
    %68 = math.tanh %67 : vector<2x32xf32>
    %cst_34 = arith.constant dense<0.000000e+00> : vector<2x32xf32>
    %69 = tpu.matmul %68, %3, %cst_34 {dimension_numbers = #tpu.dot_dimension_numbers<[1], [0], [0], [1], [0, 0, 1, 1], [], []>} : vector<2x32xf32>, vector<32x32xf32>, vector<2x32xf32> -> vector<2x32xf32>
    %70 = arith.addf %69, %7 : vector<2x32xf32>
    %cst_35 = arith.constant dense<0.000000e+00> : vector<2x32xf32>
    %71 = tpu.matmul %62, %4, %cst_35 {dimension_numbers = #tpu.dot_dimension_numbers<[1], [0], [0], [1], [0, 0, 1, 1], [], []>} : vector<2x32xf32>, vector<32x32xf32>, vector<2x32xf32> -> vector<2x32xf32>
    %72 = arith.addf %70, %71 : vector<2x32xf32>
    %73 = math.tanh %72 : vector<2x32xf32>
    %74 = arith.addf %63, %73 : vector<2x32xf32>
    %75 = vector.extract_strided_slice %16 {offsets = [5, 0, 0], sizes = [1, 2, 32], strides = [1, 1, 1]} : vector<8x2x32xf32> to vector<1x2x32xf32>
    %76 = vector.shape_cast %75 : vector<1x2x32xf32> to vector<2x32xf32>
    %cst_36 = arith.constant dense<0.000000e+00> : vector<2x32xf32>
    %77 = tpu.matmul %68, %2, %cst_36 {dimension_numbers = #tpu.dot_dimension_numbers<[1], [0], [0], [1], [0, 0, 1, 1], [], []>} : vector<2x32xf32>, vector<32x32xf32>, vector<2x32xf32> -> vector<2x32xf32>
    %78 = arith.addf %76, %77 : vector<2x32xf32>
    %79 = math.tanh %78 : vector<2x32xf32>
    %cst_37 = arith.constant dense<0.000000e+00> : vector<2x32xf32>
    %80 = tpu.matmul %79, %3, %cst_37 {dimension_numbers = #tpu.dot_dimension_numbers<[1], [0], [0], [1], [0, 0, 1, 1], [], []>} : vector<2x32xf32>, vector<32x32xf32>, vector<2x32xf32> -> vector<2x32xf32>
    %81 = arith.addf %80, %7 : vector<2x32xf32>
    %cst_38 = arith.constant dense<0.000000e+00> : vector<2x32xf32>
    %82 = tpu.matmul %73, %4, %cst_38 {dimension_numbers = #tpu.dot_dimension_numbers<[1], [0], [0], [1], [0, 0, 1, 1], [], []>} : vector<2x32xf32>, vector<32x32xf32>, vector<2x32xf32> -> vector<2x32xf32>
    %83 = arith.addf %81, %82 : vector<2x32xf32>
    %84 = math.tanh %83 : vector<2x32xf32>
    %85 = arith.addf %74, %84 : vector<2x32xf32>
    %86 = vector.extract_strided_slice %16 {offsets = [6, 0, 0], sizes = [1, 2, 32], strides = [1, 1, 1]} : vector<8x2x32xf32> to vector<1x2x32xf32>
    %87 = vector.shape_cast %86 : vector<1x2x32xf32> to vector<2x32xf32>
    %cst_39 = arith.constant dense<0.000000e+00> : vector<2x32xf32>
    %88 = tpu.matmul %79, %2, %cst_39 {dimension_numbers = #tpu.dot_dimension_numbers<[1], [0], [0], [1], [0, 0, 1, 1], [], []>} : vector<2x32xf32>, vector<32x32xf32>, vector<2x32xf32> -> vector<2x32xf32>
    %89 = arith.addf %87, %88 : vector<2x32xf32>
    %90 = math.tanh %89 : vector<2x32xf32>
    %cst_40 = arith.constant dense<0.000000e+00> : vector<2x32xf32>
    %91 = tpu.matmul %90, %3, %cst_40 {dimension_numbers = #tpu.dot_dimension_numbers<[1], [0], [0], [1], [0, 0, 1, 1], [], []>} : vector<2x32xf32>, vector<32x32xf32>, vector<2x32xf32> -> vector<2x32xf32>
    %92 = arith.addf %91, %7 : vector<2x32xf32>
    %cst_41 = arith.constant dense<0.000000e+00> : vector<2x32xf32>
    %93 = tpu.matmul %84, %4, %cst_41 {dimension_numbers = #tpu.dot_dimension_numbers<[1], [0], [0], [1], [0, 0, 1, 1], [], []>} : vector<2x32xf32>, vector<32x32xf32>, vector<2x32xf32> -> vector<2x32xf32>
    %94 = arith.addf %92, %93 : vector<2x32xf32>
    %95 = math.tanh %94 : vector<2x32xf32>
    %96 = arith.addf %85, %95 : vector<2x32xf32>
    %97 = vector.extract_strided_slice %16 {offsets = [7, 0, 0], sizes = [1, 2, 32], strides = [1, 1, 1]} : vector<8x2x32xf32> to vector<1x2x32xf32>
    %98 = vector.shape_cast %97 : vector<1x2x32xf32> to vector<2x32xf32>
    %cst_42 = arith.constant dense<0.000000e+00> : vector<2x32xf32>
    %99 = tpu.matmul %90, %2, %cst_42 {dimension_numbers = #tpu.dot_dimension_numbers<[1], [0], [0], [1], [0, 0, 1, 1], [], []>} : vector<2x32xf32>, vector<32x32xf32>, vector<2x32xf32> -> vector<2x32xf32>
    %100 = arith.addf %98, %99 : vector<2x32xf32>
    %101 = math.tanh %100 : vector<2x32xf32>
    %cst_43 = arith.constant dense<0.000000e+00> : vector<2x32xf32>
    %102 = tpu.matmul %101, %3, %cst_43 {dimension_numbers = #tpu.dot_dimension_numbers<[1], [0], [0], [1], [0, 0, 1, 1], [], []>} : vector<2x32xf32>, vector<32x32xf32>, vector<2x32xf32> -> vector<2x32xf32>
    %103 = arith.addf %102, %7 : vector<2x32xf32>
    %cst_44 = arith.constant dense<0.000000e+00> : vector<2x32xf32>
    %104 = tpu.matmul %95, %4, %cst_44 {dimension_numbers = #tpu.dot_dimension_numbers<[1], [0], [0], [1], [0, 0, 1, 1], [], []>} : vector<2x32xf32>, vector<32x32xf32>, vector<2x32xf32> -> vector<2x32xf32>
    %105 = arith.addf %103, %104 : vector<2x32xf32>
    %106 = math.tanh %105 : vector<2x32xf32>
    %107 = arith.addf %96, %106 : vector<2x32xf32>
    %cst_45 = arith.constant dense<0.000000e+00> : vector<2x5xf32>
    %108 = tpu.matmul %107, %8, %cst_45 {dimension_numbers = #tpu.dot_dimension_numbers<[1], [0], [0], [1], [0, 0, 1, 1], [], []>} : vector<2x32xf32>, vector<32x5xf32>, vector<2x5xf32> -> vector<2x5xf32>
    %109 = vector.broadcast %9 : vector<1x5xf32> to vector<2x5xf32>
    %110 = arith.addf %108, %109 : vector<2x5xf32>
    %c0_46 = arith.constant 0 : index
    %c0_47 = arith.constant 0 : index
    %111 = vector.load %arg10[%c0_46, %c0_47] : memref<2x5xf32, #tpu.memory_space<vmem>>, vector<2x5xf32>
    tpu.vector_store %arg10[%c0_46, %c0_47], %110 {strides = array<i32>} : memref<2x5xf32, #tpu.memory_space<vmem>>, vector<2x5xf32>,
    return
  }
  func.func @transform_0(%arg0: i32) -> (i32, i32, i32) {
    %c0_i32 = arith.constant 0 : i32
    %c0_i32_0 = arith.constant 0 : i32
    %c0_i32_1 = arith.constant 0 : i32
    return %c0_i32, %arg0, %c0_i32_0 : i32, i32, i32
  }
  func.func @transform_1(%arg0: i32) -> (i32, i32) {
    %c0_i32 = arith.constant 0 : i32
    %c0_i32_0 = arith.constant 0 : i32
    %c0_i32_1 = arith.constant 0 : i32
    return %c0_i32, %c0_i32_0 : i32, i32
  }
  func.func @transform_2(%arg0: i32) -> (i32, i32) {
    %c0_i32 = arith.constant 0 : i32
    %c0_i32_0 = arith.constant 0 : i32
    %c0_i32_1 = arith.constant 0 : i32
    return %c0_i32, %c0_i32_0 : i32, i32
  }
  func.func @transform_3(%arg0: i32) -> (i32, i32) {
    %c0_i32 = arith.constant 0 : i32
    %c0_i32_0 = arith.constant 0 : i32
    %c0_i32_1 = arith.constant 0 : i32
    return %c0_i32, %c0_i32_0 : i32, i32
  }
  func.func @transform_4(%arg0: i32) -> (i32, i32) {
    %c0_i32 = arith.constant 0 : i32
    %c0_i32_0 = arith.constant 0 : i32
    %c0_i32_1 = arith.constant 0 : i32
    return %c0_i32, %c0_i32_0 : i32, i32
  }
  func.func @transform_5(%arg0: i32) -> (i32, i32) {
    %c0_i32 = arith.constant 0 : i32
    %c0_i32_0 = arith.constant 0 : i32
    %c0_i32_1 = arith.constant 0 : i32
    return %c0_i32, %c0_i32_0 : i32, i32
  }
  func.func @transform_6(%arg0: i32) -> (i32, i32) {
    %c0_i32 = arith.constant 0 : i32
    %c0_i32_0 = arith.constant 0 : i32
    %c0_i32_1 = arith.constant 0 : i32
    return %c0_i32, %c0_i32_0 : i32, i32
  }
  func.func @transform_7(%arg0: i32) -> (i32, i32) {
    %c0_i32 = arith.constant 0 : i32
    %c0_i32_0 = arith.constant 0 : i32
    %c0_i32_1 = arith.constant 0 : i32
    return %c0_i32, %c0_i32_0 : i32, i32
  }
  func.func @transform_8(%arg0: i32) -> (i32, i32) {
    %c0_i32 = arith.constant 0 : i32
    %c0_i32_0 = arith.constant 0 : i32
    %c0_i32_1 = arith.constant 0 : i32
    return %c0_i32, %c0_i32_0 : i32, i32
  }
  func.func @transform_9(%arg0: i32) -> (i32, i32) {
    %c0_i32 = arith.constant 0 : i32
    %c0_i32_0 = arith.constant 0 : i32
    return %arg0, %c0_i32 : i32, i32
  }
}

</mosaic_0001>

<bundles_post_ra>
// kernel: tpu_custom_call.1
= control target key start
LH: loop header
LB: loop body
LE: loop exit
PB: predicated region body
PF: predicated region fallthrough
CT: control target
= control target key end

     0   :  { %14 = vsyncpa [#allocation3], 0  ;;  %s3346_s0 = inlined_call_operand.hbm [shape: f32[8,2,12], index: 0, kind: input, shape index: {}]   ;;  %s3347_s1 = inlined_call_operand.hbm [shape: f32[12,32], index: 1, kind: input, shape index: {}]   ;;  %s3348_s2 = inlined_call_operand.vmem [shape: f32[32,32], index: 2, kind: input, shape index: {}]   ;;  %s3349_s3 = inlined_call_operand.vmem [shape: f32[1,32], index: 3, kind: input, shape index: {}]   ;;  %s3350_s4 = inlined_call_operand.hbm [shape: f32[32,32], index: 4, kind: input, shape index: {}]   ;;  %s3351_s5 = inlined_call_operand.hbm [shape: f32[32,32], index: 5, kind: input, shape index: {}]   ;;  %s3352_s6 = inlined_call_operand.vmem [shape: f32[1,32], index: 6, kind: input, shape index: {}]   ;;  %s3353_s7 = inlined_call_operand.vmem [shape: f32[32,5], index: 7, kind: input, shape index: {}]   ;;  %s3354_s8 = inlined_call_operand.vmem [shape: f32[1,5], index: 8, kind: input, shape index: {}]   ;;  %s3355_s9 = inlined_call_operand.hbm [shape: f32[2,5], index: 9, kind: output, shape index: {}]  }
   0x1   :  { %15 = vsyncpa [#allocation6], 0 }
   0x2   :  { %16 = vsyncpa [#allocation9], 0 }
   0x3   :  { %17 = vsyncpa [#allocation4], 0  ;;  %s2950_s30 = smov [#allocation5]   ;;  %s2832_s13 = scalar_lea.hbm %s3347_s1, 256 }
   0x4   :  { %s35_s10 = sshll.u32 %s2950_s30, 4  ;;  %p2833_p0 = scmp.ne.s32.totalorder %s3347_s1, %s2832_s13  ;;  %s36_s10 = int_to_ptr.vmem [resolvable:$true] %s35_s10 }
   0x5   :  { %p2836_p1 = scmp.lt.u32.totalorder %s2832_s13, %s3347_s1 }
   0x7   :  { %p2838_p2 = pnand %p2836_p1, %p2833_p0 }
   0x9   :  { %2841 = shalt.err (!%p2838_p2)
}
   0xa   :  { %s2842_s18 = scalar_lea.vmem %s36_s10, 256  ;;  %p2847_p4 = scmp.lt.s32.totalorder %s36_s10, %s36_s10 }
   0xb   :  { %p2843_p3 = scmp.ne.s32.totalorder %s36_s10, %s2842_s18  ;;  %p2848_p5 = scmp.lt.s32.totalorder %s2842_s18, %s2842_s18 }
   0xd   :  { %p2849_p6 = por %p2848_p5, %p2847_p4 }
   0xf   :  { %p2850_p7 = pnand %p2849_p6, %p2843_p3 }
  0x11   :  { %2853 = shalt.err (!%p2850_p7)
}
  0x12   :  { %s2951_s19 = smov 128   ;;  %s2952_s20 = smov 8  }
  0x13   :  { %41 = dma.hbm_to_vmem [thread:$0]  %s3347_s1, 256, %s36_s10, [#allocation6], %s2951_s19, %s2951_s19, %s2952_s20  }
  0x14   :  { %s2953_s23 = smov [#allocation2]   ;;  %s2854_s27 = scalar_lea.hbm %s3346_s0, 256 }
  0x15   :  { %s23_s24 = sshll.u32 %s2953_s23, 4  ;;  %p2855_p8 = scmp.ne.s32.totalorder %s3346_s0, %s2854_s27  ;;  %s24_s24 = int_to_ptr.vmem [resolvable:$true] %s23_s24 }
  0x16   :  { %p2858_p9 = scmp.lt.u32.totalorder %s2854_s27, %s3346_s0 }
  0x18   :  { %p2860_p10 = pnand %p2858_p9, %p2855_p8 }
  0x1a   :  { %2863 = shalt.err (!%p2860_p10)
}
  0x1b   :  { %s2864_s12 = scalar_lea.vmem %s24_s24, 256  ;;  %p2869_p12 = scmp.lt.s32.totalorder %s24_s24, %s24_s24 }
  0x1c   :  { %p2865_p11 = scmp.ne.s32.totalorder %s24_s24, %s2864_s12  ;;  %p2870_p13 = scmp.lt.s32.totalorder %s2864_s12, %s2864_s12 }
  0x1e   :  { %p2871_p0 = por %p2870_p13, %p2869_p12 }
  0x20   :  { %p2872_p1 = pnand %p2871_p0, %p2865_p11 }
  0x22   :  { %2875 = shalt.err (!%p2872_p1)
}
  0x23   :  { %s2954_s1 = smov 32   ;;  %s2955_s10 = smov 2  }
  0x24   :  { %29 = dma.hbm_to_vmem [thread:$0]  %s3346_s0, 256, %s24_s24, [#allocation3], %s2954_s1, %s2954_s1, %s2955_s10  }
  0x25   :  { %s2956_s15 = smov [#allocation7]   ;;  %s2957_s17 = smov [#allocation8]  }
  0x26   :  { %s51_s16 = sshll.u32 %s2956_s15, 4  ;;  %s63_s18 = sshll.u32 %s2957_s17, 4  ;;  %s52_s16 = int_to_ptr.vmem [resolvable:$true] %s51_s16  ;;  %s3041_s18 = int_to_ptr.vmem [resolvable:$true] %s63_s18 }
  0x27   :  { %s2876_s23 = scalar_lea.hbm %s3350_s4, 512 }
  0x28   :  { %p2877_p2 = scmp.ne.s32.totalorder %s3350_s4, %s2876_s23  ;;  %p2880_p3 = scmp.lt.u32.totalorder %s2876_s23, %s3350_s4 }
  0x2a   :  { %p2882_p4 = pnand %p2880_p3, %p2877_p2 }
  0x2c   :  { %2885 = shalt.err (!%p2882_p4)
}
  0x2d   :  { %s2886_s0 = scalar_lea.vmem %s52_s16, 512  ;;  %p2891_p6 = scmp.lt.s32.totalorder %s52_s16, %s52_s16 }
  0x2e   :  { %p2887_p5 = scmp.ne.s32.totalorder %s52_s16, %s2886_s0  ;;  %p2892_p7 = scmp.lt.s32.totalorder %s2886_s0, %s2886_s0 }
  0x30   :  { %p2893_p8 = por %p2892_p7, %p2891_p6 }
  0x32   :  { %p2894_p9 = pnand %p2893_p8, %p2887_p5 }
  0x34   :  { %2897 = shalt.err (!%p2894_p9)
}
  0x35   :  { %57 = dma.hbm_to_vmem [thread:$0]  %s3350_s4, 512, %s52_s16, [#allocation6], %s2951_s19, %s2951_s19, %s2952_s20  }
  0x36   :  { %s2898_s12 = scalar_lea.hbm %s3351_s5, 512 }
  0x37   :  { %p2899_p10 = scmp.ne.s32.totalorder %s3351_s5, %s2898_s12  ;;  %p2902_p11 = scmp.lt.u32.totalorder %s2898_s12, %s3351_s5 }
  0x39   :  { %p2904_p12 = pnand %p2902_p11, %p2899_p10 }
  0x3b   :  { %2907 = shalt.err (!%p2904_p12)
}
  0x3c   :  { %s2908_s15 = scalar_lea.vmem %s3041_s18, 512  ;;  %p2913_p0 = scmp.lt.s32.totalorder %s3041_s18, %s3041_s18 }
  0x3d   :  { %p2909_p13 = scmp.ne.s32.totalorder %s3041_s18, %s2908_s15  ;;  %p2914_p1 = scmp.lt.s32.totalorder %s2908_s15, %s2908_s15 }
  0x3f   :  { %p2915_p2 = por %p2914_p1, %p2913_p0 }
  0x41   :  { %p2916_p3 = pnand %p2915_p2, %p2909_p13 }
  0x43   :  { %2919 = shalt.err (!%p2916_p3)
}
  0x44   :  { %69 = dma.hbm_to_vmem [thread:$0]  %s3351_s5, 512, %s3041_s18, [#allocation9], %s2951_s19, %s2951_s19, %s2952_s20  }
  0x45   :  { %2942 = dma.done.wait [#allocation3], 256  }
  0x46   :  { %2943 = vsyncadd [#allocation3], 4294967040 }
  0x47   :  { %2944 = dma.done.wait [#allocation6], 768  }
  0x48   :  { %2945 = vsyncadd [#allocation6], 4294966528 }
  0x49   :  { %2946 = dma.done.wait [#allocation9], 512  }
  0x4a   :  { %2947 = vsyncadd [#allocation9], 4294966784  ;;  %v142_v0 = vlaneseq  ;;  %v2958_v1 = vmov 0.0|0.0   ;;  %v2959_v2 = vmov 1983009808   ;;  %vm2960_vm0 = vmmov 0  }
  0x4b   :  { %2612 = vmatprep.subr.bf16.mxu1 %v2958_v1  ;;  %v140_v3 = vunpack.c.l.s4 %v2959_v2  ;;  %v2961_v4 = vmov 0.0   ;;  %vm176_vm1 = vcmask 1043456   ;;  %vm2962_vm2 = vmmov 1   ;;  %v96_v8 = vld [vmem:[#allocation5] sm:$0xff]  ;;  %v97_v9 = vld [vmem:[#allocation5 + $0x8] sm:$0xf] }
  0x4c   :  { %2339 = vmatprep.mubr.msk.f32.mxu1 %vm2960_vm0, %v2961_v4  ;;  %v143_v5 = vshrl.u32 %v142_v0, 7  ;;  %vm3081_vm3 = vmpackc.low %vm176_vm1, %vm2962_vm2  ;;  %v98_v10 = vld [vmem:[%s3348_s2] sm:$0xff]  ;;  %v2606_v12 = vpack.c.bf16 %v97_v9, %v96_v8  ;;  %v99_v13 = vld [vmem:[%s3348_s2 + $0x8] sm:$0xff]  ;;  %vm171_vm4 = vcmask 97280   ;;  %vm299_vm5 = vcmask 261120   ;;  %s2963_s10 = smov [#allocation10]  }
  0x4d   :  { %v141_v6 = vunpack.c.0.s8 %v140_v3  ;;  %v88_v14 = vld [vmem:[#allocation2] sm:$0x3]  ;;  %v89_v15 = vld [vmem:[#allocation2 + $0x2] sm:$0x3]  ;;  %v3093_v16 = vpack.c.bf16 %v99_v13, %v98_v10  ;;  %v90_v17 = vld [vmem:[#allocation2 + $0x4] sm:$0x3] }
  0x4e   :  { %v91_v18 = vld [vmem:[#allocation2 + $0x6] sm:$0x3]  ;;  %v137_v19 = vcombine.low %v88_v14, %v89_v15  ;;  %v92_v20 = vld [vmem:[#allocation2 + $0x8] sm:$0x3]  ;;  %2608 = vmatprep.subr.msk.bf16.mxu0 %vm3081_vm3, %v2606_v12  ;;  %v93_v22 = vld [vmem:[#allocation2 + $0xa] sm:$0x3] }
  0x4f   :  { %v3088_v11 = vsub.s32 %v141_v6, %v143_v5  ;;  %v138_v21 = vcombine.low %v90_v17, %v91_v18  ;;  %v94_v23 = vld [vmem:[#allocation2 + $0xc] sm:$0x3]  ;;  %v95_v24 = vld [vmem:[#allocation2 + $0xe] sm:$0x3]  ;;  %2611 = vmatpush3.bf16.msk.msra.mxu0 %vm3081_vm3, %v2606_v12  ;;  %2614 = vmatpush3.bf16.msra.mxu1 %v3093_v16  ;;  %v154_v26 = vcombine.low %v92_v20, %v93_v22  ;;  %v100_v28 = vld [vmem:[%s3348_s2 + $0x10] sm:$0xff]  ;;  %vm2147_vm6 = vcmask 33792  }
  0x50   :  { %v155_v27 = vcombine.low %v94_v23, %v95_v24  ;;  %v101_v29 = vld [vmem:[%s3348_s2 + $0x18] sm:$0xff]  ;;  %2615 = vmatprep.subr.bf16.mxu1 %v2958_v1  ;;  %2618 = vmatprep.subr.bf16.mxu0 %v2958_v1  ;;  %v102_v36 = vld [vmem:[#allocation7] sm:$0xff]  ;;  %v103_v37 = vld [vmem:[#allocation7 + $0x8] sm:$0xff] }
  0x51   :  { %v145_v25 = vrot.slane %v137_v19, %v3088_v11  ;;  %v152_v30 = vrot.slane %v138_v21, %v3088_v11  ;;  %v3109_v31 = vpack.c.bf16 %v101_v29, %v100_v28  ;;  %v162_v32 = vrot.slane %v154_v26, %v3088_v11  ;;  %v104_v38 = vld [vmem:[#allocation7 + $0x10] sm:$0xff]  ;;  %v105_v40 = vld [vmem:[#allocation7 + $0x18] sm:$0xff]  ;;  %v2167_v42 = vld [vmem:[%s3349_s3] ss:$0 sm:$0xff] }
  0x52   :  { %v169_v33 = vrot.slane %v155_v27, %v3088_v11  ;;  %v3125_v39 = vpack.c.bf16 %v103_v37, %v102_v36  ;;  %v3128_v41 = vpack.c.bf16 %v105_v40, %v104_v38  ;;  %v106_v51 = vld [vmem:[#allocation8] sm:$0xff]  ;;  %v107_v52 = vld [vmem:[#allocation8 + $0x8] sm:$0xff]  ;;  %v108_v54 = vld [vmem:[#allocation8 + $0x10] sm:$0xff] }
  0x53   :  { %v153_v34 = vcombine.low %v145_v25, %v152_v30  ;;  %2617 = vmatpush3.bf16.msra.mxu1 %v3109_v31  ;;  %v3142_v53 = vpack.c.bf16 %v107_v52, %v106_v51  ;;  %v109_v55 = vld [vmem:[#allocation8 + $0x18] sm:$0xff]  ;;  %v3170_v62 = vld [vmem:[%s3352_s6] ss:$0 sm:$0xff] }
  0x54   :  { %v170_v35 = vcombine.low %v162_v32, %v169_v33  ;;  %2630 = vmatprep.subr.bf16.mxu1 %v2958_v1  ;;  %v3147_v57 = vpack.c.bf16 %v109_v55, %v108_v54 }
  0x55   :  { %2328 = vmatprep.mubr.msk.f32.mxu0 %vm171_vm4, %v153_v34 }
  0x56   :  { %2329 = vmatmul.mubr.msk.f32.vlgmr.msra.gmra.mrb[0].mxu0 %vm171_vm4, %v170_v35  ;;  %2340 = vmatmul.mubr.f32.vlgmr.msra.gmra.mrb[0].mxu1 %v2961_v4 }
  0x57   :  { %2350 = vmatprep.mubr.msk.f32.mxu0 %vm2960_vm0, %v2961_v4  ;;  %2632 = vmatpush3.bf16.msra.mxu1 %v3093_v16 }
  0x58   :  { %2372 = vmatprep.mubr.msk.f32.mxu1 %vm2960_vm0, %v2961_v4  ;;  %2633 = vmatprep.subr.bf16.mxu1 %v2958_v1 }
  0x59   :  { %2620 = vmatpush3.bf16.msra.mxu0 %v3125_v39 }
  0x5a   :  { %2621 = vmatprep.subr.bf16.mxu0 %v2958_v1 }
  0x5b   :  { %2635 = vmatpush3.bf16.msra.mxu1 %v3109_v31 }
  0x5c   :  { %2636 = vmatprep.subr.bf16.mxu1 %v2958_v1 }
  0x5d   :  { %2623 = vmatpush3.bf16.msra.mxu0 %v3128_v41 }
  0x5e   :  { %2624 = vmatprep.subr.bf16.mxu0 %v2958_v1 }
 0x129   :  { %v2330_v43 = vpop.f32.mrb[0].mxu0  ;;  %v369_v46 = vpop.f32.mrb[0].mxu1 }
 0x12a   :  { %v3136_v44 = vadd.f32 %v2330_v43, %v2167_v42  ;;  %v246_v45 = vpop.f32.mrb[1].mxu0  ;;  %v2341_v48 = vpop.f32.mrb[1].mxu1 }
 0x12b   :  { %v3138_v47 = vadd.f32 %v2167_v42, %v246_v45 }
 0x12c   :  { %v281_v29 = vrot.slane %v3136_v44, %v3088_v11  ;;  %v274_v54 = vcombine.high %v3136_v44, %v3136_v44 }
 0x12d   :  { %v264_v49 = vrot.slane %v3138_v47, %v3088_v11  ;;  %v257_v6 = vcombine.high %v3138_v47, %v3138_v47 }
 0x12e   :  { %v289_v42 = vcombine.high %v281_v29, %v281_v29  ;;  %v288_v55 = vrot.slane %v274_v54, %v3088_v11 }
 0x12f   :  { %v373_v50 = vadd.f32 %v369_v46, %v264_v49  ;;  %v272_v58 = vcombine.high %v264_v49, %v264_v49  ;;  %v271_v7 = vrot.slane %v257_v6, %v3088_v11 }
 0x131   :  { %2800 = vtanh.f32 %v373_v50  ;;  %v273_v18 = vcombine.high %v271_v7, %v271_v7 }
 0x13b   :  { %v2801_v56 = vpop.eup %2800 }
 0x13c   :  { %2351 = vmatmul.mubr.msk.f32.vlgmr.msra.gmra.mrb[2].mxu0 %vm299_vm5, %v2801_v56  ;;  %2373 = vmatmul.mubr.msk.f32.vlgmr.msra.gmra.mrb[2].mxu1 %vm299_vm5, %v2801_v56 }
 0x13d   :  { %2626 = vmatpush3.bf16.msra.mxu0 %v3142_v53  ;;  %2361 = vmatprep.mubr.msk.f32.mxu0 %vm2960_vm0, %v2961_v4 }
 0x13e   :  { %2627 = vmatprep.subr.bf16.mxu0 %v2958_v1  ;;  %2638 = vmatpush3.bf16.msra.mxu1 %v3125_v39 }
 0x13f   :  { %2639 = vmatprep.subr.bf16.mxu1 %v2958_v1  ;;  %2383 = vmatprep.mubr.msk.f32.mxu1 %vm2960_vm0, %v2961_v4 }
 0x141   :  { %2629 = vmatpush3.bf16.msra.mxu0 %v3147_v57 }
 0x142   :  { %2648 = vmatprep.subr.bf16.mxu0 %v2958_v1  ;;  %2641 = vmatpush3.bf16.msra.mxu1 %v3128_v41 }
 0x143   :  { %2642 = vmatprep.subr.bf16.mxu1 %v2958_v1 }
 0x144   :  { %2362 = vmatmul.mubr.f32.vlgmr.msra.gmra.mrb[2].mxu0 %v2961_v4 }
 0x145   :  { %2650 = vmatpush3.bf16.msra.mxu0 %v3093_v16  ;;  %2405 = vmatprep.mubr.msk.f32.mxu0 %vm2960_vm0, %v2961_v4 }
 0x146   :  { %2651 = vmatprep.subr.bf16.mxu0 %v2958_v1 }
 0x149   :  { %2653 = vmatpush3.bf16.msra.mxu0 %v3109_v31 }
 0x14a   :  { %2654 = vmatprep.subr.bf16.mxu0 %v2958_v1 }
 0x20f   :  { %v587_v59 = vpop.f32.mrb[2].mxu1 }
 0x210   :  { %v591_v60 = vadd.f32 %v587_v59, %v272_v58  ;;  %v2374_v61 = vpop.f32.mrb[3].mxu1 }
 0x212   :  { %2802 = vtanh.f32 %v591_v60 }
 0x217   :  { %v514_v63 = vpop.f32.mrb[2].mxu0 }
 0x218   :  { %v2762_v0 = vadd.f32 %v3170_v62, %v514_v63  ;;  %v2363_v2 = vpop.f32.mrb[3].mxu0 }
 0x21a   :  { %2804 = vtanh.f32 %v2762_v0 }
 0x21c   :  { %v2803_v3 = vpop.eup %2802 }
 0x21d   :  { %2384 = vmatmul.mubr.msk.f32.vlgmr.msra.gmra.mrb[4].mxu1 %vm299_vm5, %v2803_v3  ;;  %2406 = vmatmul.mubr.msk.f32.vlgmr.msra.gmra.mrb[4].mxu0 %vm299_vm5, %v2803_v3 }
 0x21e   :  { %2644 = vmatpush3.bf16.msra.mxu1 %v3142_v53  ;;  %2394 = vmatprep.mubr.msk.f32.mxu1 %vm2960_vm0, %v2961_v4 }
 0x21f   :  { %2645 = vmatprep.subr.bf16.mxu1 %v2958_v1  ;;  %2656 = vmatpush3.bf16.msra.mxu0 %v3125_v39 }
 0x220   :  { %2657 = vmatprep.subr.bf16.mxu0 %v2958_v1  ;;  %2416 = vmatprep.mubr.msk.f32.mxu0 %vm2960_vm0, %v2961_v4 }
 0x222   :  { %2647 = vmatpush3.bf16.msra.mxu1 %v3147_v57 }
 0x223   :  { %2666 = vmatprep.subr.bf16.mxu1 %v2958_v1  ;;  %2659 = vmatpush3.bf16.msra.mxu0 %v3128_v41 }
 0x224   :  { %v2805_v5 = vpop.eup %2804  ;;  %2660 = vmatprep.subr.bf16.mxu0 %v2958_v1 }
 0x225   :  { %2395 = vmatmul.mubr.msk.f32.vlgmr.msra.gmra.mrb[4].mxu1 %vm299_vm5, %v2805_v5 }
 0x226   :  { %2668 = vmatpush3.bf16.msra.mxu1 %v3093_v16  ;;  %2438 = vmatprep.mubr.msk.f32.mxu1 %vm2960_vm0, %v2961_v4 }
 0x227   :  { %2669 = vmatprep.subr.bf16.mxu1 %v2958_v1 }
 0x22a   :  { %2671 = vmatpush3.bf16.msra.mxu1 %v3109_v31 }
 0x22b   :  { %2672 = vmatprep.subr.bf16.mxu1 %v2958_v1 }
 0x2f0   :  { %v808_v8 = vpop.f32.mrb[4].mxu0 }
 0x2f1   :  { %v812_v9 = vadd.f32 %v808_v8, %v271_v7  ;;  %v2407_v10 = vpop.f32.mrb[5].mxu0 }
 0x2f2   :  { %v118_v10 = vld [vmem:[%s3353_s7 + $0x8] sm:$0xff] }
 0x2f3   :  { %2806 = vtanh.f32 %v812_v9  ;;  %v117_v9 = vld [vmem:[%s3353_s7] sm:$0xff] }
 0x2f8   :  { %v735_v12 = vpop.f32.mrb[4].mxu1 }
 0x2f9   :  { %v2763_v13 = vadd.f32 %v3170_v62, %v735_v12  ;;  %v2396_v14 = vpop.f32.mrb[5].mxu1 }
 0x2fb   :  { %2808 = vtanh.f32 %v2763_v13 }
 0x2fd   :  { %v2807_v15 = vpop.eup %2806 }
 0x2fe   :  { %2417 = vmatmul.mubr.msk.f32.vlgmr.msra.gmra.mrb[6].mxu0 %vm299_vm5, %v2807_v15  ;;  %2439 = vmatmul.mubr.msk.f32.vlgmr.msra.gmra.mrb[6].mxu1 %vm299_vm5, %v2807_v15 }
 0x2ff   :  { %2662 = vmatpush3.bf16.msra.mxu0 %v3142_v53  ;;  %2427 = vmatprep.mubr.msk.f32.mxu0 %vm2960_vm0, %v2961_v4 }
 0x300   :  { %2663 = vmatprep.subr.bf16.mxu0 %v2958_v1  ;;  %2674 = vmatpush3.bf16.msra.mxu1 %v3125_v39 }
 0x301   :  { %2675 = vmatprep.subr.bf16.mxu1 %v2958_v1  ;;  %2449 = vmatprep.mubr.msk.f32.mxu1 %vm2960_vm0, %v2961_v4 }
 0x303   :  { %2665 = vmatpush3.bf16.msra.mxu0 %v3147_v57 }
 0x304   :  { %2684 = vmatprep.subr.bf16.mxu0 %v2958_v1  ;;  %2677 = vmatpush3.bf16.msra.mxu1 %v3128_v41 }
 0x305   :  { %v2809_v17 = vpop.eup %2808  ;;  %2678 = vmatprep.subr.bf16.mxu1 %v2958_v1 }
 0x306   :  { %2428 = vmatmul.mubr.msk.f32.vlgmr.msra.gmra.mrb[6].mxu0 %vm299_vm5, %v2809_v17  ;;  %v741_v26 = vadd.f32 %v2809_v17, %v2805_v5 }
 0x307   :  { %2686 = vmatpush3.bf16.msra.mxu0 %v3093_v16  ;;  %2471 = vmatprep.mubr.msk.f32.mxu0 %vm2960_vm0, %v2961_v4 }
 0x308   :  { %2687 = vmatprep.subr.bf16.mxu0 %v2958_v1 }
 0x30b   :  { %2689 = vmatpush3.bf16.msra.mxu0 %v3109_v31 }
 0x30c   :  { %2690 = vmatprep.subr.bf16.mxu0 %v2958_v1 }
 0x3d1   :  { %v1029_v19 = vpop.f32.mrb[6].mxu1 }
 0x3d2   :  { %v1033_v20 = vadd.f32 %v1029_v19, %v273_v18  ;;  %v2440_v21 = vpop.f32.mrb[7].mxu1  ;;  %v2193_v19 = vld [vmem:[%s3354_s8] ss:$0 sm:$0xff] }
 0x3d4   :  { %2810 = vtanh.f32 %v1033_v20 }
 0x3d9   :  { %v956_v22 = vpop.f32.mrb[6].mxu0 }
 0x3da   :  { %v2764_v23 = vadd.f32 %v3170_v62, %v956_v22  ;;  %v2429_v24 = vpop.f32.mrb[7].mxu0 }
 0x3dc   :  { %2812 = vtanh.f32 %v2764_v23 }
 0x3de   :  { %v2811_v25 = vpop.eup %2810 }
 0x3df   :  { %2450 = vmatmul.mubr.msk.f32.vlgmr.msra.gmra.mrb[8].mxu1 %vm299_vm5, %v2811_v25  ;;  %2472 = vmatmul.mubr.msk.f32.vlgmr.msra.gmra.mrb[8].mxu0 %vm299_vm5, %v2811_v25 }
 0x3e0   :  { %2680 = vmatpush3.bf16.msra.mxu1 %v3142_v53  ;;  %2460 = vmatprep.mubr.msk.f32.mxu1 %vm2960_vm0, %v2961_v4 }
 0x3e1   :  { %2681 = vmatprep.subr.bf16.mxu1 %v2958_v1  ;;  %2692 = vmatpush3.bf16.msra.mxu0 %v3125_v39 }
 0x3e2   :  { %2693 = vmatprep.subr.bf16.mxu0 %v2958_v1  ;;  %2482 = vmatprep.mubr.msk.f32.mxu0 %vm2960_vm0, %v2961_v4 }
 0x3e4   :  { %2683 = vmatpush3.bf16.msra.mxu1 %v3147_v57 }
 0x3e5   :  { %2702 = vmatprep.subr.bf16.mxu1 %v2958_v1  ;;  %2695 = vmatpush3.bf16.msra.mxu0 %v3128_v41 }
 0x3e6   :  { %v2813_v27 = vpop.eup %2812  ;;  %2696 = vmatprep.subr.bf16.mxu0 %v2958_v1 }
 0x3e7   :  { %v962_v28 = vadd.f32 %v2813_v27, %v741_v26  ;;  %2461 = vmatmul.mubr.msk.f32.vlgmr.msra.gmra.mrb[8].mxu1 %vm299_vm5, %v2813_v27 }
 0x3e8   :  { %2704 = vmatpush3.bf16.msra.mxu1 %v3093_v16  ;;  %2504 = vmatprep.mubr.msk.f32.mxu1 %vm2960_vm0, %v2961_v4 }
 0x3e9   :  { %2705 = vmatprep.subr.bf16.mxu1 %v2958_v1 }
 0x3ec   :  { %2707 = vmatpush3.bf16.msra.mxu1 %v3109_v31 }
 0x3ed   :  { %2708 = vmatprep.subr.bf16.mxu1 %v2958_v1 }
 0x4b2   :  { %v1250_v30 = vpop.f32.mrb[8].mxu0 }
 0x4b3   :  { %v1254_v32 = vadd.f32 %v1250_v30, %v281_v29  ;;  %v2473_v33 = vpop.f32.mrb[9].mxu0 }
 0x4b5   :  { %2814 = vtanh.f32 %v1254_v32 }
 0x4ba   :  { %v1177_v34 = vpop.f32.mrb[8].mxu1 }
 0x4bb   :  { %v2765_v35 = vadd.f32 %v3170_v62, %v1177_v34  ;;  %v2462_v36 = vpop.f32.mrb[9].mxu1 }
 0x4bd   :  { %2816 = vtanh.f32 %v2765_v35 }
 0x4bf   :  { %v2815_v37 = vpop.eup %2814 }
 0x4c0   :  { %2483 = vmatmul.mubr.msk.f32.vlgmr.msra.gmra.mrb[10].mxu0 %vm299_vm5, %v2815_v37  ;;  %2505 = vmatmul.mubr.msk.f32.vlgmr.msra.gmra.mrb[10].mxu1 %vm299_vm5, %v2815_v37 }
 0x4c1   :  { %2698 = vmatpush3.bf16.msra.mxu0 %v3142_v53  ;;  %2493 = vmatprep.mubr.msk.f32.mxu0 %vm2960_vm0, %v2961_v4 }
 0x4c2   :  { %2699 = vmatprep.subr.bf16.mxu0 %v2958_v1  ;;  %2710 = vmatpush3.bf16.msra.mxu1 %v3125_v39 }
 0x4c3   :  { %2711 = vmatprep.subr.bf16.mxu1 %v2958_v1  ;;  %2515 = vmatprep.mubr.msk.f32.mxu1 %vm2960_vm0, %v2961_v4 }
 0x4c5   :  { %2701 = vmatpush3.bf16.msra.mxu0 %v3147_v57 }
 0x4c6   :  { %2720 = vmatprep.subr.bf16.mxu0 %v2958_v1  ;;  %2713 = vmatpush3.bf16.msra.mxu1 %v3128_v41 }
 0x4c7   :  { %v2817_v38 = vpop.eup %2816  ;;  %2714 = vmatprep.subr.bf16.mxu1 %v2958_v1 }
 0x4c8   :  { %v1183_v40 = vadd.f32 %v2817_v38, %v962_v28  ;;  %2494 = vmatmul.mubr.msk.f32.vlgmr.msra.gmra.mrb[10].mxu0 %vm299_vm5, %v2817_v38 }
 0x4c9   :  { %2722 = vmatpush3.bf16.msra.mxu0 %v3093_v16  ;;  %2537 = vmatprep.mubr.msk.f32.mxu0 %vm2960_vm0, %v2961_v4 }
 0x4ca   :  { %2723 = vmatprep.subr.bf16.mxu0 %v2958_v1 }
 0x4cd   :  { %2725 = vmatpush3.bf16.msra.mxu0 %v3109_v31 }
 0x4ce   :  { %2726 = vmatprep.subr.bf16.mxu0 %v2958_v1 }
 0x593   :  { %v1471_v43 = vpop.f32.mrb[10].mxu1 }
 0x594   :  { %v1475_v45 = vadd.f32 %v1471_v43, %v289_v42  ;;  %v2506_v46 = vpop.f32.mrb[11].mxu1 }
 0x596   :  { %2818 = vtanh.f32 %v1475_v45 }
 0x59b   :  { %v1398_v47 = vpop.f32.mrb[10].mxu0 }
 0x59c   :  { %v2766_v48 = vadd.f32 %v3170_v62, %v1398_v47  ;;  %v2495_v49 = vpop.f32.mrb[11].mxu0 }
 0x59e   :  { %2820 = vtanh.f32 %v2766_v48 }
 0x5a0   :  { %v2819_v50 = vpop.eup %2818 }
 0x5a1   :  { %2516 = vmatmul.mubr.msk.f32.vlgmr.msra.gmra.mrb[12].mxu1 %vm299_vm5, %v2819_v50  ;;  %2538 = vmatmul.mubr.msk.f32.vlgmr.msra.gmra.mrb[12].mxu0 %vm299_vm5, %v2819_v50 }
 0x5a2   :  { %2716 = vmatpush3.bf16.msra.mxu1 %v3142_v53  ;;  %2526 = vmatprep.mubr.msk.f32.mxu1 %vm2960_vm0, %v2961_v4 }
 0x5a3   :  { %2717 = vmatprep.subr.bf16.mxu1 %v2958_v1  ;;  %2728 = vmatpush3.bf16.msra.mxu0 %v3125_v39 }
 0x5a4   :  { %2729 = vmatprep.subr.bf16.mxu0 %v2958_v1  ;;  %2548 = vmatprep.mubr.msk.f32.mxu0 %vm2960_vm0, %v2961_v4 }
 0x5a6   :  { %2719 = vmatpush3.bf16.msra.mxu1 %v3147_v57 }
 0x5a7   :  { %2738 = vmatprep.subr.bf16.mxu1 %v2958_v1  ;;  %2731 = vmatpush3.bf16.msra.mxu0 %v3128_v41 }
 0x5a8   :  { %v2821_v51 = vpop.eup %2820  ;;  %2732 = vmatprep.subr.bf16.mxu0 %v2958_v1 }
 0x5a9   :  { %v1404_v52 = vadd.f32 %v2821_v51, %v1183_v40  ;;  %2527 = vmatmul.mubr.msk.f32.vlgmr.msra.gmra.mrb[12].mxu1 %vm299_vm5, %v2821_v51 }
 0x5aa   :  { %2740 = vmatpush3.bf16.msra.mxu1 %v3093_v16  ;;  %2570 = vmatprep.mubr.msk.f32.mxu1 %vm2960_vm0, %v2961_v4 }
 0x5ab   :  { %2741 = vmatprep.subr.bf16.mxu1 %v2958_v1 }
 0x5ae   :  { %2743 = vmatpush3.bf16.msra.mxu1 %v3109_v31 }
 0x5af   :  { %2744 = vmatprep.subr.bf16.mxu1 %v2958_v1 }
 0x674   :  { %v1692_v56 = vpop.f32.mrb[12].mxu0 }
 0x675   :  { %v1696_v58 = vadd.f32 %v1692_v56, %v288_v55  ;;  %v2539_v59 = vpop.f32.mrb[13].mxu0 }
 0x677   :  { %2822 = vtanh.f32 %v1696_v58 }
 0x67c   :  { %v1619_v60 = vpop.f32.mrb[12].mxu1 }
 0x67d   :  { %v2767_v16 = vadd.f32 %v3170_v62, %v1619_v60  ;;  %v2528_v61 = vpop.f32.mrb[13].mxu1 }
 0x67f   :  { %2824 = vtanh.f32 %v2767_v16 }
 0x681   :  { %v2823_v63 = vpop.eup %2822 }
 0x682   :  { %2549 = vmatmul.mubr.msk.f32.vlgmr.msra.gmra.mrb[14].mxu0 %vm299_vm5, %v2823_v63  ;;  %2571 = vmatmul.mubr.msk.f32.vlgmr.msra.gmra.mrb[14].mxu1 %vm299_vm5, %v2823_v63 }
 0x683   :  { %2734 = vmatpush3.bf16.msra.mxu0 %v3142_v53  ;;  %2559 = vmatprep.mubr.msk.f32.mxu0 %vm2960_vm0, %v2961_v4 }
 0x684   :  { %2735 = vmatprep.subr.bf16.mxu0 %v2958_v1  ;;  %2746 = vmatpush3.bf16.msra.mxu1 %v3125_v39  ;;  %v290_v39 = vcombine.high %v288_v55, %v288_v55 }
 0x685   :  { %2747 = vmatprep.subr.bf16.mxu1 %v2958_v1  ;;  %2581 = vmatprep.mubr.msk.f32.mxu1 %vm2960_vm0, %v2961_v4 }
 0x687   :  { %2737 = vmatpush3.bf16.msra.mxu0 %v3147_v57 }
 0x688   :  { %2749 = vmatpush3.bf16.msra.mxu1 %v3128_v41  ;;  %2756 = vmatprep.subr.bf16.mxu0 %v2958_v1 }
 0x689   :  { %v2825_v11 = vpop.eup %2824  ;;  %2750 = vmatprep.subr.bf16.mxu1 %v2958_v1 }
 0x68a   :  { %v1625_v31 = vadd.f32 %v2825_v11, %v1404_v52  ;;  %2560 = vmatmul.mubr.msk.f32.vlgmr.msra.gmra.mrb[14].mxu0 %vm299_vm5, %v2825_v11 }
 0x68b   :  { %2603 = vmatprep.mubr.msk.f32.mxu0 %vm2960_vm0, %v2961_v4 }
 0x755   :  { %v1913_v44 = vpop.f32.mrb[14].mxu1 }
 0x756   :  { %v1917_v0 = vadd.f32 %v1913_v44, %v290_v39  ;;  %v2572_v2 = vpop.f32.mrb[15].mxu1 }
 0x758   :  { %2826 = vtanh.f32 %v1917_v0 }
 0x75d   :  { %v1840_v3 = vpop.f32.mrb[14].mxu0 }
 0x75e   :  { %v2768_v5 = vadd.f32 %v3170_v62, %v1840_v3  ;;  %v2561_v41 = vpop.f32.mrb[15].mxu0 }
 0x760   :  { %2828 = vtanh.f32 %v2768_v5 }
 0x762   :  { %v2827_v6 = vpop.eup %2826 }
 0x763   :  { %2582 = vmatmul.mubr.msk.f32.vlgmr.msra.gmra.mrb[16].mxu1 %vm299_vm5, %v2827_v6 }
 0x764   :  { %2752 = vmatpush3.bf16.msra.mxu1 %v3142_v53  ;;  %2592 = vmatprep.mubr.msk.f32.mxu1 %vm2960_vm0, %v2961_v4  ;;  %v119_v4 = vld [vmem:[%s3353_s7 + $0x10] sm:$0xff]  ;;  %v2757_v53 = vpack.c.bf16 %v118_v10, %v117_v9 }
 0x765   :  { %2753 = vmatprep.subr.bf16.mxu1 %v2958_v1 }
 0x766   :  { %2758 = vmatpush3.bf16.msra.mxu0 %v2757_v53 }
 0x767   :  { %2759 = vmatprep.subr.bf16.mxu0 %v2958_v1 }
 0x768   :  { %2755 = vmatpush3.bf16.msra.mxu1 %v3147_v57  ;;  %v120_v57 = vld [vmem:[%s3353_s7 + $0x18] sm:$0xff]  ;;  %s2155_s7 = sshll.u32 %s2963_s10, 4  ;;  %s2156_s7 = int_to_ptr.vmem [resolvable:$true] %s2155_s7 }
 0x769   :  { %v2760_v12 = vpack.c.bf16 %v120_v57, %v119_v4  ;;  %s2920_s13 = scalar_lea.vmem %s2156_s7, 32  ;;  %p2925_p5 = scmp.lt.s32.totalorder %s2156_s7, %s2156_s7 }
 0x76a   :  { %v2829_v7 = vpop.eup %2828  ;;  %p2921_p4 = scmp.ne.s32.totalorder %s2156_s7, %s2920_s13  ;;  %p2926_p6 = scmp.lt.s32.totalorder %s2920_s13, %s2920_s13 }
 0x76b   :  { %v1846_v8 = vadd.f32 %v2829_v7, %v1625_v31  ;;  %2593 = vmatmul.mubr.msk.f32.vlgmr.msra.gmra.mrb[16].mxu1 %vm299_vm5, %v2829_v7  ;;  %2761 = vmatpush3.bf16.msra.mxu0 %v2760_v12 }
 0x76c   :  { %p2927_p7 = por %p2926_p6, %p2925_p5 }
 0x76e   :  { %p2928_p8 = pnand %p2927_p7, %p2921_p4 }
 0x83e   :  { %v2061_v13 = vpop.f32.mrb[16].mxu1 }
 0x83f   :  { %v2769_v14 = vadd.f32 %v3170_v62, %v2061_v13  ;;  %v2594_v15 = vpop.f32.mrb[17].mxu1 }
 0x841   :  { %2830 = vtanh.f32 %v2769_v14 }
 0x84b   :  { %v2831_v17 = vpop.eup %2830 }
 0x84c   :  { %v2067_v18 = vadd.f32 %v2831_v17, %v1846_v8 }
 0x84e   :  { %2604 = vmatmul.mubr.msk.f32.vlgmr.msra.gmra.mrb[16].mxu0 %vm299_vm5, %v2067_v18 }
 0x921   :  { %v2143_v20 = vpop.f32.mrb[16].mxu0 }
 0x922   :  { %v2144_v21 = vadd.f32 %v2193_v19, %v2143_v20  ;;  %v2605_v1 = vpop.f32.mrb[17].mxu0 }
 0x924   :  { %2148 = vst.msk [vmem:[#allocation10] sm:$0x3] %vm2147_vm6, %v2144_v21 }
 0x925   :  { %2931 = shalt.err (!%p2928_p8)
}
 0x926   :  { %s2932_s4 = scalar_lea.hbm %s3355_s9, 32 }
 0x927   :  { %p2933_p9 = scmp.ne.s32.totalorder %s3355_s9, %s2932_s4  ;;  %p2936_p10 = scmp.lt.u32.totalorder %s2932_s4, %s3355_s9 }
 0x929   :  { %p2938_p11 = pnand %p2936_p10, %p2933_p9 }
 0x92b   :  { %2941 = shalt.err (!%p2938_p11)
}
 0x92c   :  { %2158 = dma.vmem_to_hbm [thread:$0]  %s2156_s7, 32, %s3355_s9, [#allocation4]  }
 0x92d   :  { %2948 = dma.done.wait [#allocation4], 32  }
 0x92e   :  { %2949 = vsyncadd [#allocation4], 4294967264 }
 0x92f   :  { %2162 = vsyncpa [#allocation3], 1 }
 0x930   :  { %2163 = vsyncpa [#allocation6], 1 }
 0x931   :  { %2164 = vsyncpa [#allocation9], 1 }
 0x932   :  { %2165 = vsyncpa [#allocation4], 1 }

</bundles_post_ra>
